<compile_context>
chip_gen: v7x
topology: tpu7x:2x2x1
jax: 0.10.0
libtpu: 0.0.40
codegen_flags: <defaults>
</compile_context>

<pallas_src>
import functools

import jax
import jax.numpy as jnp
import numpy as np
from jax.experimental import pallas as pl
from jax.experimental.pallas import tpu as pltpu


_TARGET_BLOCK_BYTES = 6 * 1024 * 1024   # per-input block; ~4x this lives in VMEM
_VMEM_LIMIT_BYTES = 48 * 1024 * 1024    # < 64 MiB physical on v7x, << 128 MiB on v5e/v6e


def _scale_kernel(w_ref, x_ref, o_ref):
    # w_ref: VMEM (tile_r, 1) or (1, tile_l) f32 scales (broadcast multiply).
    # x_ref, o_ref: VMEM (tile_r, tile_l) lane-dense slabs in x's dtype.
    # Compute in f32 (w is f32 so the product promotes), cast once on store.
    o_ref[...] = (x_ref[...] * w_ref[...]).astype(o_ref.dtype)


def _sublane_quantum(itemsize):
    # f32 -> 8, bf16/fp16 -> 16, int8/fp8 -> 32 (sub-32-bit dtypes pack along sublanes).
    return max(8, 32 // int(itemsize))


def _pick_tiles(rows, lanes, itemsize, target_bytes=_TARGET_BLOCK_BYTES):
    """Pick (tile_r, tile_l) so each x block is ~target_bytes and layout-legal."""
    q = _sublane_quantum(itemsize)

    # Lane tile: multiple of 128 for unmasked stores; if `lanes` is not a
    # multiple of 128 the only legal choice is the full extent (masked stores,
    # unavoidable for that shape).
    if lanes % 128 == 0:
        max_tl = max(128, ((target_bytes // (q * itemsize)) // 128) * 128)
        tl = min(lanes, max_tl)
    else:
        tl = lanes

    # Row tile: as many rows as fit the target, rounded to the packing quantum
    # (or the full extent, which is always legal).
    tr = target_bytes // max(1, tl * itemsize)
    if tr >= rows:
        tr = rows
    else:
        tr = max(q, (tr // q) * q)
        tr = min(tr, rows)
    return tr, tl


@functools.partial(jax.jit, static_argnames=("donate_x",))
def scale_module_forward(weight, x, *, donate_x=False):
    """weight: (1, C, 1, 1), x: (N, C, H, W) -> (N, C, H, W) == weight * x."""
    N, C, H, W = x.shape
    assert weight.shape == (1, C, 1, 1), "dims must be [1, C, 1, 1]"
    dtype = x.dtype
    itemsize = jnp.dtype(dtype).itemsize
    L = H * W
    CL = C * L

    if L % 128 == 0 or CL % 128 != 0:
        # Layout A: (N*C, H*W) rows with a per-row scale. Also the fallback when
        # neither view is 128-aligned (full-extent lane dim is always legal).
        rows, lanes = N * C, L
        x2 = x.reshape(rows, lanes)
        w = jnp.broadcast_to(
            weight.reshape(1, C).astype(jnp.float32), (N, C)
        ).reshape(rows, 1)
        per_row = True
    else:
        # Layout B: small / unaligned spatial map but C*H*W is a multiple of 128.
        # Flatten to (N, C*H*W) with a per-lane scale row -> unmasked stores.
        # (If N < 8 this under-fills sublanes, still far better than masked lanes.)
        rows, lanes = N, CL
        x2 = x.reshape(rows, lanes)
        w = jnp.repeat(weight.reshape(C).astype(jnp.float32), L).reshape(1, lanes)
        per_row = False

    tr, tl = _pick_tiles(rows, lanes, itemsize)
    grid = (pl.cdiv(rows, tr), pl.cdiv(lanes, tl))  # lanes is the inner grid axis

    if per_row:
        # Block index (i, 0) is constant across the inner (lane) axis -> the
        # small scale sliver is only DMA'd when the row chunk changes.
        w_spec = pl.BlockSpec((tr, 1), lambda i, j: (i, 0))
    else:
        w_spec = pl.BlockSpec((1, tl), lambda i, j: (0, j))

    out2 = pl.pallas_call(
        _scale_kernel,
        out_shape=jax.ShapeDtypeStruct((rows, lanes), dtype),
        grid_spec=pltpu.PrefetchScalarGridSpec(
            num_scalar_prefetch=0,
            grid=grid,
            in_specs=[
                w_spec,                                        # scales
                pl.BlockSpec((tr, tl), lambda i, j: (i, j)),   # x chunk
            ],
            out_specs=pl.BlockSpec((tr, tl), lambda i, j: (i, j)),
        ),
        compiler_params=pltpu.CompilerParams(
            dimension_semantics=("parallel", "parallel"),
            vmem_limit_bytes=_VMEM_LIMIT_BYTES,
        ),
        # Inference-only option: write the result in place of x (halves HBM
        # footprint; not valid if x is needed as a residual for the VJP).
        input_output_aliases=({1: 0} if donate_x else {}),
    )(w, x2)

    return out2.reshape(N, C, H, W)


if __name__ == "__main__":
    init_scale = 0.1  # as used by WTConv2d when constructing _ScaleModule
    key = jax.random.PRNGKey(0)

    # --- Main check: NCHW input with 128-aligned H*W (layout A, per-row scale) ---
    N, C, H, W = 2, 4, 16, 16
    x = jax.random.normal(key, (N, C, H, W), dtype=jnp.float32)
    # Deterministic parameter init, mirroring: torch.ones(*dims) * init_scale
    weight = jnp.ones((1, C, 1, 1), dtype=jnp.float32) * init_scale

    out = scale_module_forward(weight, x)
    out = jax.block_until_ready(out)
    ref = weight * x
    assert out.shape == x.shape and out.dtype == x.dtype
    np.testing.assert_allclose(np.asarray(out), np.asarray(ref), rtol=1e-6, atol=1e-6)

    # --- Secondary check: small unaligned spatial map (layout B, per-lane scale) ---
    N2, C2, H2, W2 = 2, 8, 4, 4   # H*W = 16 (not 128-aligned), C*H*W = 128
    x2 = jax.random.normal(jax.random.PRNGKey(1), (N2, C2, H2, W2), dtype=jnp.float32)
    w2 = jnp.ones((1, C2, 1, 1), dtype=jnp.float32) * init_scale
    out2 = jax.block_until_ready(scale_module_forward(w2, x2))
    np.testing.assert_allclose(np.asarray(out2), np.asarray(w2 * x2),
                               rtol=1e-6, atol=1e-6)

    print("KERNEL_OK")
</pallas_src>

<mosaic_0001>
module attributes {stable_mosaic.version = 11 : i64} {
  func.func @_scale_kernel(%arg0: i32, %arg1: i32, %arg2: memref<8x1xf32, #tpu.memory_space<vmem>>, %arg3: memref<8x256xf32, #tpu.memory_space<vmem>>, %arg4: memref<8x256xf32, #tpu.memory_space<vmem>>) attributes {dimension_semantics = [#tpu.dimension_semantics<parallel>, #tpu.dimension_semantics<parallel>], iteration_bounds = array<i64: 1, 1>, scalar_prefetch = 0 : i64, scratch_operands = 0 : i64, tpu.core_type = #tpu.core_type<tc>, window_params = [{transform_indices = @transform_0, window_bounds = array<i64: 8, 1>}, {transform_indices = @transform_1, window_bounds = array<i64: 8, 256>}, {transform_indices = @transform_2, window_bounds = array<i64: 8, 256>}]} {
    %c0 = arith.constant 0 : index
    %c0_0 = arith.constant 0 : index
    %0 = vector.load %arg3[%c0, %c0_0] : memref<8x256xf32, #tpu.memory_space<vmem>>, vector<8x256xf32>
    %c0_1 = arith.constant 0 : index
    %c0_2 = arith.constant 0 : index
    %1 = vector.load %arg2[%c0_1, %c0_2] : memref<8x1xf32, #tpu.memory_space<vmem>>, vector<8x1xf32>
    %2 = vector.broadcast %1 : vector<8x1xf32> to vector<8x256xf32>
    %3 = arith.mulf %0, %2 : vector<8x256xf32>
    %c0_3 = arith.constant 0 : index
    %c0_4 = arith.constant 0 : index
    %4 = vector.load %arg4[%c0_3, %c0_4] : memref<8x256xf32, #tpu.memory_space<vmem>>, vector<8x256xf32>
    tpu.vector_store %arg4[%c0_3, %c0_4], %3 {strides = array<i32>} : memref<8x256xf32, #tpu.memory_space<vmem>>, vector<8x256xf32>,
    return
  }
  func.func @transform_0(%arg0: i32, %arg1: i32) -> (i32, i32) {
    %c0_i32 = arith.constant 0 : i32
    %c0_i32_0 = arith.constant 0 : i32
    return %arg0, %c0_i32 : i32, i32
  }
  func.func @transform_1(%arg0: i32, %arg1: i32) -> (i32, i32) {
    %c0_i32 = arith.constant 0 : i32
    return %arg0, %arg1 : i32, i32
  }
  func.func @transform_2(%arg0: i32, %arg1: i32) -> (i32, i32) {
    %c0_i32 = arith.constant 0 : i32
    return %arg0, %arg1 : i32, i32
  }
}

</mosaic_0001>

<bundles_post_ra>
// kernel: scale_module_forward.1
= control target key start
LH: loop header
LB: loop body
LE: loop exit
PB: predicated region body
PF: predicated region fallthrough
CT: control target
= control target key end

     0   :  { %v29_v0 = vmov 0   ;;  %s60_s0 = inlined_call_operand.vmem [shape: f32[8,1], index: 0, kind: input, shape index: {}]   ;;  %s61_s1 = inlined_call_operand.vmem [shape: f32[8,256], index: 1, kind: input, shape index: {}]   ;;  %s62_s2 = inlined_call_operand.vmem [shape: f32[8,256], index: 2, kind: output, shape index: {}]  }
   0x1   :  { %28 = vset.pattern.permute.xlu0 %v29_v0  ;;  %v13_v1 = vld [vmem:[%s60_s0] sm:$0xff]  ;;  %v12_v3 = vld [vmem:[%s61_s1 + $0x8] sm:$0xff] }
   0x2   :  { %16 = vperm.xlu0 %28, %v13_v1   ;;  %v11_v2 = vld [vmem:[%s61_s1] sm:$0xff] }
  0x81   :  { %v17_v4 = vpop.permute.xlu0 %16 }
  0x82   :  { %v19_v5 = vmul.f32 %v17_v4, %v11_v2  ;;  %v20_v6 = vmul.f32 %v17_v4, %v12_v3 }
  0x84   :  { %21 = vst [vmem:[%s62_s2] sm:$0xff] %v19_v5  ;;  %22 = vst [vmem:[%s62_s2 + $0x8] sm:$0xff] %v20_v6 }

</bundles_post_ra>
